<compile_context>
chip_gen: v7x
topology: tpu7x:2x2x1
jax: 0.10.0
libtpu: 0.0.40
codegen_flags: <defaults>
</compile_context>

<pallas_src>
import functools

import jax
import jax.numpy as jnp
from jax.experimental import pallas as pl
from jax.experimental.pallas import tpu as pltpu


def _flat_layout(n_elems):
    """Pick a lane-dense (rows_padded, TN) layout and row-tile TM for n elems."""
    TN = 1024 if n_elems >= 1024 else 128          # lane-dense last dim
    rows = -(-n_elems // TN)                       # cdiv
    TM_MAX = 512                                   # 512x1024 f32 = 2 MiB / buffer
    if rows <= TM_MAX:
        TM = max(8, -(-rows // 8) * 8)             # round up to sublane multiple
        rows_padded = TM                           # single row tile
    else:
        TM = TM_MAX
        rows_padded = -(-rows // TM) * TM
    return rows_padded, TN, TM


def _hinge_reduce_kernel(x_ref, t_ref, out_ref, acc_ref, *, fn_weight, denom):
    """Tiled weighted hinge loss with a grid-resident accumulator -> (1,1) SMEM scalar."""
    i = pl.program_id(0)

    @pl.when(i == 0)
    def _():
        acc_ref[...] = jnp.zeros_like(acc_ref)
        out_ref[0, 0] = jnp.float32(0.0)

    x = x_ref[...].astype(jnp.float32)
    t = 2.0 * t_ref[...].astype(jnp.float32) - 1.0          # {0,1} -> {-1,+1}
    hinge = jnp.maximum(1.0 - x * t, 0.0)                    # clamp(1 - x*t, min=0)
    w = jnp.where(t == 1.0, jnp.float32(fn_weight), jnp.float32(1.0))
    acc_ref[...] += w * hinge                                # pure-VPU per-tile work

    @pl.when(i == pl.num_programs(0) - 1)
    def _():
        # Single cross-lane reduce + divide, only once at the very end.
        out_ref[0, 0] = jnp.sum(acc_ref[...]) / jnp.float32(denom)


def _hinge_elementwise_kernel(x_ref, t_ref, out_ref, *, fn_weight):
    """Tiled elementwise weighted hinge loss (reduction='none')."""
    x = x_ref[...].astype(jnp.float32)
    t = 2.0 * t_ref[...].astype(jnp.float32) - 1.0
    hinge = jnp.maximum(1.0 - x * t, 0.0)
    w = jnp.where(t == 1.0, jnp.float32(fn_weight), jnp.float32(1.0))
    out_ref[...] = w * hinge


def custom_hinge_loss(inputs, targets, *, false_negative_weight,
                      margin=1.0, reduction="mean"):
    """Pallas implementation of CustomHingeLoss.forward.

    inputs, targets: same-shape float arrays (targets in {0, 1}).
    """
    del margin  # matches PyTorch: forward hard-codes 1, margin is never used
    assert inputs.shape == targets.shape
    orig_shape = inputs.shape
    n = int(inputs.size)

    x = inputs.astype(jnp.float32).reshape(-1)
    t = targets.astype(jnp.float32).reshape(-1)

    rows_p, TN, TM = _flat_layout(n)
    n_pad = rows_p * TN

    if n_pad > n:
        # Safe padding: input=2, target=1 -> hinge = max(1 - 2, 0) = 0, so the
        # padded region contributes exactly zero to sum/mean.
        pad = n_pad - n
        x = jnp.concatenate([x, jnp.full((pad,), 2.0, jnp.float32)])
        t = jnp.concatenate([t, jnp.ones((pad,), jnp.float32)])

    x2 = x.reshape(rows_p, TN)
    t2 = t.reshape(rows_p, TN)
    grid = (rows_p // TM,)

    if reduction in ("mean", "sum"):
        denom = float(n) if reduction == "mean" else 1.0
        kernel = functools.partial(
            _hinge_reduce_kernel,
            fn_weight=float(false_negative_weight),
            denom=denom,
        )
        out = pl.pallas_call(
            kernel,
            out_shape=jax.ShapeDtypeStruct((1, 1), jnp.float32),
            grid=grid,
            in_specs=[
                pl.BlockSpec((TM, TN), lambda i: (i, 0)),
                pl.BlockSpec((TM, TN), lambda i: (i, 0)),
            ],
            out_specs=pl.BlockSpec((1, 1), lambda i: (0, 0),
                                   memory_space=pltpu.MemorySpace.SMEM),
            scratch_shapes=[pltpu.VMEM((TM, TN), jnp.float32)],
            compiler_params=pltpu.CompilerParams(
                dimension_semantics=("arbitrary",)),
        )(x2, t2)
        return out[0, 0]

    # reduction is None / 'none' -> elementwise output
    kernel = functools.partial(
        _hinge_elementwise_kernel,
        fn_weight=float(false_negative_weight),
    )
    out2 = pl.pallas_call(
        kernel,
        out_shape=jax.ShapeDtypeStruct((rows_p, TN), jnp.float32),
        grid=grid,
        in_specs=[
            pl.BlockSpec((TM, TN), lambda i: (i, 0)),
            pl.BlockSpec((TM, TN), lambda i: (i, 0)),
        ],
        out_specs=pl.BlockSpec((TM, TN), lambda i: (i, 0)),
        compiler_params=pltpu.CompilerParams(
            dimension_semantics=("parallel",)),
    )(x2, t2)
    return out2.reshape(-1)[:n].reshape(orig_shape)


def _reference(inputs, targets, false_negative_weight, reduction="mean"):
    """Pure-JAX reference mirroring the PyTorch forward."""
    t = 2.0 * targets - 1.0
    hinge = jnp.maximum(1.0 - inputs * t, 0.0)
    w = jnp.where(t == 1.0, false_negative_weight, 1.0)
    whl = w * hinge
    if reduction == "mean":
        return whl.mean()
    if reduction == "sum":
        return whl.sum()
    return whl


if __name__ == "__main__":
    key = jax.random.PRNGKey(0)
    fn_weight = 2.5

    # --- small shape (single small tile, padding path) --------------------
    k1, k2, k3, k4 = jax.random.split(key, 4)
    batch, feat = 8, 32
    inputs_s = jax.random.normal(k1, (batch, feat), dtype=jnp.float32)
    targets_s = jax.random.bernoulli(k2, 0.5, (batch, feat)).astype(jnp.float32)

    out_mean = custom_hinge_loss(inputs_s, targets_s,
                                 false_negative_weight=fn_weight,
                                 reduction="mean")
    out_sum = custom_hinge_loss(inputs_s, targets_s,
                                false_negative_weight=fn_weight,
                                reduction="sum")
    out_none = custom_hinge_loss(inputs_s, targets_s,
                                 false_negative_weight=fn_weight,
                                 reduction=None)
    jax.block_until_ready((out_mean, out_sum, out_none))

    assert jnp.allclose(out_mean, _reference(inputs_s, targets_s, fn_weight, "mean"),
                        rtol=1e-5, atol=1e-5)
    assert jnp.allclose(out_sum, _reference(inputs_s, targets_s, fn_weight, "sum"),
                        rtol=1e-5, atol=1e-5)
    assert jnp.allclose(out_none, _reference(inputs_s, targets_s, fn_weight, None),
                        rtol=1e-5, atol=1e-5)

    # --- larger, non-tile-multiple shape (multi-tile grid + padding) ------
    inputs_l = jax.random.normal(k3, (1030, 1024), dtype=jnp.float32)
    targets_l = jax.random.bernoulli(k4, 0.5, (1030, 1024)).astype(jnp.float32)

    out_mean_l = custom_hinge_loss(inputs_l, targets_l,
                                   false_negative_weight=fn_weight,
                                   reduction="mean")
    out_none_l = custom_hinge_loss(inputs_l, targets_l,
                                   false_negative_weight=fn_weight,
                                   reduction=None)
    jax.block_until_ready((out_mean_l, out_none_l))

    assert jnp.allclose(out_mean_l, _reference(inputs_l, targets_l, fn_weight, "mean"),
                        rtol=1e-4, atol=1e-4)
    assert jnp.allclose(out_none_l, _reference(inputs_l, targets_l, fn_weight, None),
                        rtol=1e-5, atol=1e-5)

    print("KERNEL_OK")
</pallas_src>

<mosaic_0001>
module attributes {stable_mosaic.version = 11 : i64} {
  func.func @_hinge_reduce_kernel(%arg0: i32, %arg1: memref<8x128xf32, #tpu.memory_space<vmem>>, %arg2: memref<8x128xf32, #tpu.memory_space<vmem>>, %arg3: memref<1x1xf32, #tpu.memory_space<smem>>, %arg4: memref<8x128xf32, #tpu.memory_space<vmem>>) attributes {dimension_semantics = [#tpu.dimension_semantics<arbitrary>], iteration_bounds = array<i64: 1>, scalar_prefetch = 0 : i64, scratch_operands = 1 : i64, tpu.core_type = #tpu.core_type<tc>, window_params = [{transform_indices = @transform_0, window_bounds = array<i64: 8, 128>}, {transform_indices = @transform_1, window_bounds = array<i64: 8, 128>}, {transform_indices = @transform_2, window_bounds = array<i64: 1, 1>}]} {
    %c0_i32 = arith.constant 0 : i32
    %0 = arith.cmpi eq, %arg0, %c0_i32 : i32
    %1 = arith.extui %0 : i1 to i32
    %c0_i32_0 = arith.constant 0 : i32
    %2 = arith.cmpi ne, %1, %c0_i32_0 : i32
    scf.if %2 {
      %cst_16 = arith.constant 0.000000e+00 : f32
      %26 = vector.broadcast %cst_16 : f32 to vector<8x128xf32>
      %c0_17 = arith.constant 0 : index
      %c0_18 = arith.constant 0 : index
      %27 = vector.load %arg4[%c0_17, %c0_18] : memref<8x128xf32, #tpu.memory_space<vmem>>, vector<8x128xf32>
      tpu.vector_store %arg4[%c0_17, %c0_18], %26 {strides = array<i32>} : memref<8x128xf32, #tpu.memory_space<vmem>>, vector<8x128xf32>,
      %cst_19 = arith.constant 0.000000e+00 : f32
      %c0_20 = arith.constant 0 : index
      %c0_21 = arith.constant 0 : index
      %28 = memref.load %arg3[%c0_20, %c0_21] : memref<1x1xf32, #tpu.memory_space<smem>>
      memref.store %cst_19, %arg3[%c0_20, %c0_21] : memref<1x1xf32, #tpu.memory_space<smem>>
    } else {
    }
    %c0 = arith.constant 0 : index
    %c0_1 = arith.constant 0 : index
    %3 = vector.load %arg1[%c0, %c0_1] : memref<8x128xf32, #tpu.memory_space<vmem>>, vector<8x128xf32>
    %c0_2 = arith.constant 0 : index
    %c0_3 = arith.constant 0 : index
    %4 = vector.load %arg2[%c0_2, %c0_3] : memref<8x128xf32, #tpu.memory_space<vmem>>, vector<8x128xf32>
    %cst = arith.constant 2.000000e+00 : f32
    %5 = vector.broadcast %cst : f32 to vector<8x128xf32>
    %6 = arith.mulf %5, %4 : vector<8x128xf32>
    %cst_4 = arith.constant 1.000000e+00 : f32
    %7 = vector.broadcast %cst_4 : f32 to vector<8x128xf32>
    %8 = arith.subf %6, %7 : vector<8x128xf32>
    %9 = arith.mulf %3, %8 : vector<8x128xf32>
    %cst_5 = arith.constant 1.000000e+00 : f32
    %10 = vector.broadcast %cst_5 : f32 to vector<8x128xf32>
    %11 = arith.subf %10, %9 : vector<8x128xf32>
    %cst_6 = arith.constant 0.000000e+00 : f32
    %12 = vector.broadcast %cst_6 : f32 to vector<8x128xf32>
    %13 = arith.maximumf %11, %12 : vector<8x128xf32>
    %cst_7 = arith.constant 1.000000e+00 : f32
    %14 = vector.broadcast %cst_7 : f32 to vector<8x128xf32>
    %15 = arith.cmpf oeq, %8, %14 : vector<8x128xf32>
    %cst_8 = arith.constant 2.500000e+00 : f32
    %cst_9 = arith.constant 1.000000e+00 : f32
    %16 = vector.broadcast %cst_8 : f32 to vector<8x128xf32>
    %17 = vector.broadcast %cst_9 : f32 to vector<8x128xf32>
    %18 = arith.select %15, %16, %17 : vector<8x128xi1>, vector<8x128xf32>
    %c0_10 = arith.constant 0 : index
    %c0_11 = arith.constant 0 : index
    %19 = vector.load %arg4[%c0_10, %c0_11] : memref<8x128xf32, #tpu.memory_space<vmem>>, vector<8x128xf32>
    %20 = arith.mulf %18, %13 : vector<8x128xf32>
    %21 = arith.addf %19, %20 : vector<8x128xf32>
    %c0_12 = arith.constant 0 : index
    %c0_13 = arith.constant 0 : index
    %22 = vector.load %arg4[%c0_12, %c0_13] : memref<8x128xf32, #tpu.memory_space<vmem>>, vector<8x128xf32>
    tpu.vector_store %arg4[%c0_12, %c0_13], %21 {strides = array<i32>} : memref<8x128xf32, #tpu.memory_space<vmem>>, vector<8x128xf32>,
    %c0_i32_14 = arith.constant 0 : i32
    %23 = arith.cmpi eq, %arg0, %c0_i32_14 : i32
    %24 = arith.extui %23 : i1 to i32
    %c0_i32_15 = arith.constant 0 : i32
    %25 = arith.cmpi ne, %24, %c0_i32_15 : i32
    scf.if %25 {
      %c0_16 = arith.constant 0 : index
      %c0_17 = arith.constant 0 : index
      %26 = vector.load %arg4[%c0_16, %c0_17] : memref<8x128xf32, #tpu.memory_space<vmem>>, vector<8x128xf32>
      %27 = vector.shape_cast %26 : vector<8x128xf32> to vector<1x8x128xf32>
      %cst_18 = arith.constant dense<0.000000e+00> : vector<1xf32>
      %28 = vector.multi_reduction <add>, %27, %cst_18 [1, 2] : vector<1x8x128xf32> to vector<1xf32>
      %29 = vector.shape_cast %28 : vector<1xf32> to vector<1x1x1xf32>
      %30 = vector.extract %29[0, 0, 0] : f32 from vector<1x1x1xf32>
      %cst_19 = arith.constant 2.560000e+02 : f32
      %31 = arith.divf %30, %cst_19 : f32
      %c0_20 = arith.constant 0 : index
      %c0_21 = arith.constant 0 : index
      %32 = memref.load %arg3[%c0_20, %c0_21] : memref<1x1xf32, #tpu.memory_space<smem>>
      memref.store %31, %arg3[%c0_20, %c0_21] : memref<1x1xf32, #tpu.memory_space<smem>>
    } else {
    }
    return
  }
  func.func @transform_0(%arg0: i32) -> (i32, i32) {
    %c0_i32 = arith.constant 0 : i32
    %c0_i32_0 = arith.constant 0 : i32
    return %arg0, %c0_i32 : i32, i32
  }
  func.func @transform_1(%arg0: i32) -> (i32, i32) {
    %c0_i32 = arith.constant 0 : i32
    %c0_i32_0 = arith.constant 0 : i32
    return %arg0, %c0_i32 : i32, i32
  }
  func.func @transform_2(%arg0: i32) -> (i32, i32) {
    %c0_i32 = arith.constant 0 : i32
    %c0_i32_0 = arith.constant 0 : i32
    %c0_i32_1 = arith.constant 0 : i32
    return %c0_i32, %c0_i32_0 : i32, i32
  }
}

</mosaic_0001>

<bundles_post_ra>
// kernel: tpu_custom_call.1
= control target key start
LH: loop header
LB: loop body
LE: loop exit
PB: predicated region body
PF: predicated region fallthrough
CT: control target
= control target key end

     0   :  { %7 = vsyncpa [#allocation4], 0  ;;  %s212_s0 = inlined_call_operand.hbm [shape: f32[8,128], index: 0, kind: input, shape index: {}]   ;;  %s213_s1 = inlined_call_operand.hbm [shape: f32[8,128], index: 1, kind: input, shape index: {}]   ;;  %s214_s2 = inlined_call_operand.hbm [shape: f32[1,1], index: 2, kind: output, shape index: {}]  }
   0x1   :  { %8 = vsyncpa [#allocation7], 0 }
   0x2   :  { %9 = vsyncpa [#allocation5], 0  ;;  %s157_s9 = smov [#allocation3]   ;;  %s158_s11 = smov [#allocation6]  }
   0x3   :  { %s16_s10 = sshll.u32 %s157_s9, 4  ;;  %s26_s12 = sshll.u32 %s158_s11, 4  ;;  %s17_s10 = int_to_ptr.vmem [resolvable:$true] %s16_s10  ;;  %s27_s12 = int_to_ptr.vmem [resolvable:$true] %s26_s12 }
   0x4   :  { %s97_s15 = scalar_lea.hbm %s212_s0, 128 }
   0x5   :  { %p98_p0 = scmp.ne.s32.totalorder %s212_s0, %s97_s15  ;;  %p101_p1 = scmp.lt.u32.totalorder %s97_s15, %s212_s0 }
   0x7   :  { %p103_p2 = pnand %p101_p1, %p98_p0 }
   0x9   :  { %106 = shalt.err (!%p103_p2)
}
   0xa   :  { %s107_s20 = scalar_lea.vmem %s17_s10, 128  ;;  %p112_p4 = scmp.lt.s32.totalorder %s17_s10, %s17_s10 }
   0xb   :  { %p108_p3 = scmp.ne.s32.totalorder %s17_s10, %s107_s20  ;;  %p113_p5 = scmp.lt.s32.totalorder %s107_s20, %s107_s20 }
   0xd   :  { %p114_p6 = por %p113_p5, %p112_p4 }
   0xf   :  { %p115_p7 = pnand %p114_p6, %p108_p3 }
  0x11   :  { %118 = shalt.err (!%p115_p7)
}
  0x12   :  { %19 = dma.hbm_to_vmem [thread:$0]  %s212_s0, 128, %s17_s10, [#allocation4]  }
  0x13   :  { %s119_s25 = scalar_lea.hbm %s213_s1, 128 }
  0x14   :  { %p120_p8 = scmp.ne.s32.totalorder %s213_s1, %s119_s25  ;;  %p123_p9 = scmp.lt.u32.totalorder %s119_s25, %s213_s1 }
  0x16   :  { %p125_p10 = pnand %p123_p9, %p120_p8 }
  0x18   :  { %128 = shalt.err (!%p125_p10)
}
  0x19   :  { %s129_s30 = scalar_lea.vmem %s27_s12, 128  ;;  %p134_p12 = scmp.lt.s32.totalorder %s27_s12, %s27_s12 }
  0x1a   :  { %p130_p11 = scmp.ne.s32.totalorder %s27_s12, %s129_s30  ;;  %p135_p13 = scmp.lt.s32.totalorder %s129_s30, %s129_s30 }
  0x1c   :  { %p136_p0 = por %p135_p13, %p134_p12 }
  0x1e   :  { %p137_p1 = pnand %p136_p0, %p130_p11 }
  0x20   :  { %140 = shalt.err (!%p137_p1)
}
  0x21   :  { %29 = dma.hbm_to_vmem [thread:$0]  %s213_s1, 128, %s27_s12, [#allocation7]  }
  0x22   :  { %151 = dma.done.wait [#allocation4], 128  }
  0x23   :  { %152 = vsyncadd [#allocation4], 4294967168 }
  0x24   :  { %153 = dma.done.wait [#allocation7], 128  }
  0x25   :  { %154 = vsyncadd [#allocation7], 4294967168  ;;  %v44_v0 = vld [vmem:[#allocation6] sm:$0xff]  ;;  %v43_v2 = vld [vmem:[#allocation3] sm:$0xff]  ;;  %v159_v6 = vmov 1.0   ;;  %s141_s7 = scalar_lea.hbm %s214_s2, 16 }
  0x26   :  { %v45_v1 = vmul.f32 2.0, %v44_v0  ;;  %p142_p2 = scmp.ne.s32.totalorder %s214_s2, %s141_s7  ;;  %p145_p3 = scmp.lt.u32.totalorder %s141_s7, %s214_s2 }
  0x28   :  { %v89_v3 = vadd.f32 -1.0, %v45_v1  ;;  %p147_p4 = pnand %p145_p3, %p142_p2 }
  0x2a   :  { %v47_v4 = vmul.f32 %v89_v3, %v43_v2  ;;  %vm50_vm0 = vcmp.eq.f32.partialorder %v89_v3, 1.0 }
  0x2b   :  { %v51_v7 = vsel %vm50_vm0, 2.5, %v159_v6 }
  0x2c   :  { %v48_v5 = vsub.f32 1.0, %v47_v4 }
  0x2e   :  { %v49_v8 = vmax.f32 %v48_v5, 0.0 }
  0x30   :  { %v53_v9 = vmul.f32 %v51_v7, %v49_v8 }
  0x32   :  { %60 = vadd.xlane.f32.xlu0 %v53_v9 }
  0xbf   :  { %v61_v10 = vpop.xlane.xlu0 %60 }
  0xc0   :  { %v62_v11 = vrot.slane %v61_v10, 4 }
  0xc2   :  { %v63_v12 = vadd.f32 %v62_v11, %v61_v10 }
  0xc4   :  { %v64_v13 = vrot.slane %v63_v12, 2 }
  0xc6   :  { %v65_v14 = vadd.f32 %v64_v13, %v63_v12 }
  0xc8   :  { %v66_v15 = vrot.slane %v65_v14, 1 }
  0xca   :  { %v67_v16 = vadd.f32 %v66_v15, %v65_v14 }
  0xcc   :  { %90 = vpush %v67_v16 }
  0xfd   :  { %s91_s1 = spop %90 }
  0xfe   :  { %s71_s4 = smul.f32 0.00390625, %s91_s1 }
 0x100   :  { %73 = sst [smem:[#allocation8]] %s71_s4 }
 0x101   :  { %150 = shalt.err (!%p147_p4)
}
 0x102   :  { %s160_s12 = smov [#allocation8]  }
 0x103   :  { %81 = dma.smem_to_hbm %s160_s12, 16, %s214_s2, [#allocation5]  }
 0x104   :  { %155 = dma.done.wait [#allocation5], 16  }
 0x105   :  { %156 = vsyncadd [#allocation5], 4294967280 }
 0x106   :  { %85 = sfence }
 0x107   :  { %86 = vsyncpa [#allocation4], 1 }
 0x108   :  { %87 = vsyncpa [#allocation7], 1 }
 0x109   :  { %88 = vsyncpa [#allocation5], 1 }

</bundles_post_ra>
